<compile_context>
chip_gen: v7x
topology: tpu7x:2x2x1
jax: 0.10.0
libtpu: 0.0.40
codegen_flags: <defaults>
</compile_context>

<pallas_src>
import functools

import jax
import jax.numpy as jnp
from jax.experimental import pallas as pl
from jax.experimental.pallas import tpu as pltpu

_LANE = 128
_SUBLANE = 8


def _round_up(x, m):
    return ((x + m - 1) // m) * m


def _cdiv(a, b):
    return (a + b - 1) // b


def _vmem_capacity_bytes():
    """Per-core VMEM capacity; conservative 64 MiB (v7x) fallback."""
    try:
        cap = int(pltpu.get_tpu_info().vmem_capacity_bytes)
        if cap > 0:
            return cap
    except Exception:
        pass
    return 64 * 1024 * 1024


def _num_tensorcores():
    """Best-effort TensorCores per chip (1 on v5e/v6e, 2 on v7x megacore)."""
    try:
        info = pltpu.get_tpu_info()
        for name in ("num_cores", "core_count", "num_tensorcores",
                     "tensorcores_per_chip", "cores_per_chip"):
            v = getattr(info, name, None)
            if v is not None:
                v = int(v)
                if v in (1, 2):          # per-chip TC count is only ever 1 or 2
                    return v
    except Exception:
        pass
    try:
        v = int(getattr(jax.devices()[0], "num_cores", 0))
        if v in (1, 2):
            return v
    except Exception:
        pass
    return 1


def _loss_sums_kernel(p_ref, l_ref, out_ref, *, n_valid, tr, tiles_per_split,
                      has_tail, compute_dtype):
    """Accumulate per-sample sums over the flattened spatial axis.

    p_ref, l_ref : (B, tr, 128) tiles of logits / labels (any float/int dtype).
    out_ref      : (1, 4, B, 128) lane-wise f32 accumulators for this
                   core-split: [0]=BCE-with-logits, [1]=sigmoid(x)*y,
                   [2]=sigmoid(x), [3]=y.
    """
    c = pl.program_id(0)
    j = pl.program_id(1)

    @pl.when(j == 0)
    def _init():
        out_ref[...] = jnp.zeros_like(out_ref)

    def accumulate(mask=None):
        x = p_ref[...].astype(compute_dtype)
        y = l_ref[...].astype(compute_dtype)
        if mask is not None:
            # Mask BEFORE exp/log/reciprocal: the out-of-range rows of the
            # boundary block are never DMA'd and may hold NaN/Inf bit patterns.
            x = jnp.where(mask, x, 0.0)
            y = jnp.where(mask, y, 0.0)
        # One shared transcendental: e = exp(-|x|) drives both the numerically
        # stable BCE-with-logits and the sigmoid.
        #   bce     = max(x, 0) - x*y + log(1 + e)
        #   sigmoid = 1/(1+e)  if x >= 0   else   e/(1+e)
        e = jnp.exp(-jnp.abs(x))
        t = 1.0 + e                              # computed once (VALU)
        bce = jnp.maximum(x, 0.0) - x * y + jnp.log(t)
        inv = pl.reciprocal(t, approx=True)      # EUP vrcp
        p = jnp.where(x >= 0.0, inv, e * inv)
        if mask is not None:
            # Zero the *contributions* of masked elements: bce(0)=log 2 and
            # sigmoid(0)=0.5 are non-zero even after x,y were zeroed.
            bce = jnp.where(mask, bce, 0.0)
            p = jnp.where(mask, p, 0.0)
        out_ref[0, 0] += jnp.sum(bce.astype(jnp.float32), axis=1)
        out_ref[0, 1] += jnp.sum((p * y).astype(jnp.float32), axis=1)
        out_ref[0, 2] += jnp.sum(p.astype(jnp.float32), axis=1)
        out_ref[0, 3] += jnp.sum(y.astype(jnp.float32), axis=1)

    if has_tail:
        row0 = (c * tiles_per_split + j) * tr    # first global row of the tile
        needs_mask = (row0 + tr) * _LANE > n_valid

        @pl.when(needs_mask)
        def _ragged_tile():
            rows = jax.lax.broadcasted_iota(jnp.int32, (1, tr, _LANE), 1)
            lanes = jax.lax.broadcasted_iota(jnp.int32, (1, tr, _LANE), 2)
            flat = (row0 + rows) * _LANE + lanes
            accumulate(mask=flat < n_valid)

        @pl.when(jnp.logical_not(needs_mask))
        def _full_tile():
            accumulate()
    else:
        accumulate()


@functools.partial(jax.jit, static_argnames=(
    "area_threshold", "high_weight", "low_weight", "bce_weight", "dice_weight",
    "max_rows_per_tile", "compute_dtype"))
def area_weighted_loss(preds, labels, *, area_threshold=0.25, high_weight=1.5,
                       low_weight=1.0, bce_weight=0.5, dice_weight=0.5,
                       epsilon=1e-6, max_rows_per_tile=2048,
                       compute_dtype=jnp.float32):
    """Area-weighted hybrid BCE+Dice loss (matches the PyTorch module).

    preds/labels may be any float/int dtype (bf16 preds + int8/bf16 labels
    halve/quarter the streamed HBM bytes on v5e). `compute_dtype=jnp.bfloat16`
    can be used on v6e/v7x to cut EUP/VALU work if ~1e-2 relative loss error
    is acceptable; the default keeps f32 element-wise math.
    """
    B, H, W = preds.shape
    N = H * W

    # ---- static, chip-aware tile / grid selection ----------------------------
    cap = _vmem_capacity_bytes()            # 128 MiB on v5e/v6e, 64 MiB per TC on v7x
    vmem_budget = (cap * 3) // 8            # pipelined-tile budget
    vmem_limit = min(cap // 2, 96 * 1024 * 1024)

    def _align(dt):                         # packed sublane multiple per dtype
        return _SUBLANE * max(1, 4 // jnp.dtype(dt).itemsize)
    row_align = max(_align(preds.dtype), _align(labels.dtype))

    n_rows = _cdiv(N, _LANE)                # 128-lane rows per sample
    # 2 pipeline buffers per input + f32 element-wise temporaries (x, y, e, t,
    # bce, inv, p, ...) that Mosaic materializes at tile size.
    per_elem_bytes = 2 * (preds.dtype.itemsize + labels.dtype.itemsize) + 32
    budget_rows = max(row_align, vmem_budget // (B * _LANE * per_elem_bytes))

    if n_rows < row_align:
        # Tiny input: one full-extent block (a block dim may equal the full
        # array dim even when not a multiple of 8).
        tr = n_rows
        tiles = 1
    else:
        tr = min(max_rows_per_tile, budget_rows,
                 (n_rows // row_align) * row_align)
        tr = max(row_align, (tr // row_align) * row_align)
        tiles = _cdiv(n_rows, tr)

    # Split the row reduction across TensorCores only where that is real
    # hardware parallelism (CORE_PARALLEL is the semantics that changes
    # codegen); single-TC chips keep a single split.
    num_cores = _num_tensorcores()
    nc = 1
    if num_cores > 1 and tiles >= 2 * num_cores:
        if tiles % num_cores != 0:
            # Shrink the tile so the tile count divides evenly across cores;
            # every grid step must start inside the array (no fully-OOB block).
            t2 = _round_up(tiles, num_cores)
            tr2 = _round_up(_cdiv(n_rows, t2), row_align)
            if _cdiv(n_rows, tr2) % num_cores == 0:
                tr = tr2
                tiles = _cdiv(n_rows, tr)
        if tiles % num_cores == 0 and tiles >= 2 * num_cores:
            nc = num_cores
    tiles_per_split = tiles // nc

    # ---- layout: spatial rows fill the sublane axis --------------------------
    # (B, N) -> (B, n_rows, 128) is a free bitcast whenever N % 128 == 0; only
    # the <=127-element remainder is ever padded. The ragged tail across rows
    # is handled by in-kernel masking (no big padding pass over HBM).
    preds_flat = preds.reshape(B, N)
    labels_flat = labels.reshape(B, N)
    n_alloc = n_rows * _LANE
    if n_alloc != N:
        preds_flat = jnp.pad(preds_flat, ((0, 0), (0, n_alloc - N)))
        labels_flat = jnp.pad(labels_flat, ((0, 0), (0, n_alloc - N)))
    preds_3d = preds_flat.reshape(B, n_rows, _LANE)
    labels_3d = labels_flat.reshape(B, n_rows, _LANE)

    has_tail = (nc * tiles_per_split * tr * _LANE) != N

    kernel = functools.partial(
        _loss_sums_kernel, n_valid=N, tr=tr, tiles_per_split=tiles_per_split,
        has_tail=has_tail, compute_dtype=compute_dtype)

    def in_map(c, j):
        return (0, c * tiles_per_split + j, 0)

    sems = ((pltpu.CORE_PARALLEL, pltpu.ARBITRARY) if nc > 1
            else (pltpu.ARBITRARY, pltpu.ARBITRARY))

    sums = pl.pallas_call(
        kernel,
        out_shape=jax.ShapeDtypeStruct((nc, 4, B, _LANE), jnp.float32),
        grid_spec=pltpu.PrefetchScalarGridSpec(
            num_scalar_prefetch=0,
            grid=(nc, tiles_per_split),
            in_specs=[
                pl.BlockSpec((B, tr, _LANE), in_map),
                pl.BlockSpec((B, tr, _LANE), in_map),
            ],
            out_specs=pl.BlockSpec((1, 4, B, _LANE),
                                   lambda c, j: (c, 0, 0, 0)),
        ),
        compiler_params=pltpu.CompilerParams(
            dimension_semantics=sems,
            vmem_limit_bytes=vmem_limit),
    )(preds_3d, labels_3d)

    # ---- cheap scalar glue ----------------------------------------------------
    totals = jnp.sum(sums, axis=(0, 3))          # core splits + lanes: (4, B)
    bce_sum, intersection, pred_sum, label_sum = (
        totals[0], totals[1], totals[2], totals[3])

    bce_per_sample = bce_sum / N                 # divide by ORIGINAL N
    dice = (2.0 * intersection + epsilon) / (pred_sum + label_sum + epsilon)
    dice_per_sample = 1.0 - dice
    hybrid = bce_weight * bce_per_sample + dice_weight * dice_per_sample

    area = label_sum / N
    weights = jnp.where(area < area_threshold, high_weight, low_weight)
    return jnp.mean(weights * hybrid)


def _reference_loss(preds, labels, area_threshold=0.25, high_weight=1.5,
                    low_weight=1.0, bce_weight=0.5, dice_weight=0.5,
                    epsilon=1e-6):
    """Pure-JAX reference matching the PyTorch module semantics."""
    B = preds.shape[0]
    x = preds.reshape(B, -1).astype(jnp.float32)
    y = labels.reshape(B, -1).astype(jnp.float32)
    bce = jnp.maximum(x, 0.0) - x * y + jnp.log1p(jnp.exp(-jnp.abs(x)))
    bce_per = bce.mean(axis=1)
    p = jax.nn.sigmoid(x)
    inter = (p * y).sum(axis=1)
    union = p.sum(axis=1) + y.sum(axis=1)
    dice_per = 1.0 - (2.0 * inter + epsilon) / (union + epsilon)
    hybrid = bce_weight * bce_per + dice_weight * dice_per
    area = y.mean(axis=1)
    w = jnp.where(area < area_threshold, high_weight, low_weight)
    return jnp.mean(w * hybrid)


if __name__ == "__main__":
    key = jax.random.PRNGKey(0)
    k1, k2, k3, k4, k5, k6, k7, k8 = jax.random.split(key, 8)
    # The approx reciprocal (EUP vrcp) used for the in-kernel sigmoid is only
    # ~12-bit accurate per element, so compare at a few-e-3 tolerance.
    TOL = dict(rtol=2e-3, atol=2e-3)

    # Case 1: nominal small shape, N a multiple of 128 (no padding, no mask).
    B, H, W = 2, 16, 16
    preds = jax.random.normal(k1, (B, H, W), dtype=jnp.float32)
    labels = (jax.random.uniform(k2, (B, H, W)) > 0.6).astype(jnp.float32)
    out = jax.block_until_ready(area_weighted_loss(preds, labels))
    ref = _reference_loss(preds, labels)
    assert jnp.allclose(out, ref, **TOL), (out, ref)

    # Case 2: non-multiple-of-128 spatial size (element-level masking of the
    # ragged tail) with bf16 labels (exact for 0/1 targets, narrower HBM reads).
    B2, H2, W2 = 3, 13, 21
    preds2 = jax.random.normal(k3, (B2, H2, W2), dtype=jnp.float32)
    labels2 = (jax.random.uniform(k4, (B2, H2, W2)) > 0.4).astype(jnp.bfloat16)
    out2 = jax.block_until_ready(area_weighted_loss(preds2, labels2))
    ref2 = _reference_loss(preds2, labels2)
    assert jnp.allclose(out2, ref2, **TOL), (out2, ref2)

    # Case 3: force a small tile so the multi-tile accumulation pipeline is
    # exercised at a small shape (tile count divides the rows: no masking).
    B3, H3, W3 = 2, 64, 64
    preds3 = jax.random.normal(k5, (B3, H3, W3), dtype=jnp.float32)
    labels3 = (jax.random.uniform(k6, (B3, H3, W3)) > 0.5).astype(jnp.float32)
    out3 = jax.block_until_ready(
        area_weighted_loss(preds3, labels3, max_rows_per_tile=8))
    ref3 = _reference_loss(preds3, labels3)
    assert jnp.allclose(out3, ref3, **TOL), (out3, ref3)

    # Case 4: multi-tile + ragged tail (masked final tile, plain steady-state
    # tiles) — the new padding-free boundary handling path.
    B4, H4, W4 = 2, 40, 40
    preds4 = jax.random.normal(k7, (B4, H4, W4), dtype=jnp.float32)
    labels4 = (jax.random.uniform(k8, (B4, H4, W4)) > 0.3).astype(jnp.float32)
    out4 = jax.block_until_ready(
        area_weighted_loss(preds4, labels4, max_rows_per_tile=8))
    ref4 = _reference_loss(preds4, labels4)
    assert jnp.allclose(out4, ref4, **TOL), (out4, ref4)

    print("KERNEL_OK")
</pallas_src>

<mosaic_0001>
module attributes {stable_mosaic.version = 11 : i64} {
  func.func @_loss_sums_kernel(%arg0: i32, %arg1: i32, %arg2: memref<2x2x128xf32, #tpu.memory_space<vmem>>, %arg3: memref<2x2x128xf32, #tpu.memory_space<vmem>>, %arg4: memref<1x4x2x128xf32, #tpu.memory_space<vmem>>) attributes {dimension_semantics = [#tpu.dimension_semantics<arbitrary>, #tpu.dimension_semantics<arbitrary>], iteration_bounds = array<i64: 1, 1>, scalar_prefetch = 0 : i64, scratch_operands = 0 : i64, tpu.core_type = #tpu.core_type<tc>, window_params = [{transform_indices = @transform_0, window_bounds = array<i64: 2, 2, 128>}, {transform_indices = @transform_1, window_bounds = array<i64: 2, 2, 128>}, {transform_indices = @transform_2, window_bounds = array<i64: 1, 4, 2, 128>}]} {
    %c0_i32 = arith.constant 0 : i32
    %0 = arith.cmpi eq, %arg1, %c0_i32 : i32
    %1 = arith.extui %0 : i1 to i32
    %c0_i32_0 = arith.constant 0 : i32
    %2 = arith.cmpi ne, %1, %c0_i32_0 : i32
    scf.if %2 {
      %cst_42 = arith.constant 0.000000e+00 : f32
      %51 = vector.broadcast %cst_42 : f32 to vector<1x4x2x128xf32>
      %c0_43 = arith.constant 0 : index
      %c0_44 = arith.constant 0 : index
      %c0_45 = arith.constant 0 : index
      %c0_46 = arith.constant 0 : index
      %52 = vector.load %arg4[%c0_43, %c0_44, %c0_45, %c0_46] : memref<1x4x2x128xf32, #tpu.memory_space<vmem>>, vector<1x4x2x128xf32>
      tpu.vector_store %arg4[%c0_43, %c0_44, %c0_45, %c0_46], %51 {strides = array<i32>} : memref<1x4x2x128xf32, #tpu.memory_space<vmem>>, vector<1x4x2x128xf32>,
    } else {
    }
    %c0 = arith.constant 0 : index
    %c0_1 = arith.constant 0 : index
    %c0_2 = arith.constant 0 : index
    %3 = vector.load %arg2[%c0, %c0_1, %c0_2] : memref<2x2x128xf32, #tpu.memory_space<vmem>>, vector<2x2x128xf32>
    %c0_3 = arith.constant 0 : index
    %c0_4 = arith.constant 0 : index
    %c0_5 = arith.constant 0 : index
    %4 = vector.load %arg3[%c0_3, %c0_4, %c0_5] : memref<2x2x128xf32, #tpu.memory_space<vmem>>, vector<2x2x128xf32>
    %5 = math.absf %3 : vector<2x2x128xf32>
    %cst = arith.constant 0.000000e+00 : f32
    %6 = vector.broadcast %cst : f32 to vector<2x2x128xf32>
    %7 = arith.subf %6, %5 : vector<2x2x128xf32>
    %8 = math.exp %7 : vector<2x2x128xf32>
    %cst_6 = arith.constant 1.000000e+00 : f32
    %9 = vector.broadcast %cst_6 : f32 to vector<2x2x128xf32>
    %10 = arith.addf %9, %8 : vector<2x2x128xf32>
    %cst_7 = arith.constant 0.000000e+00 : f32
    %11 = vector.broadcast %cst_7 : f32 to vector<2x2x128xf32>
    %12 = arith.maximumf %3, %11 : vector<2x2x128xf32>
    %13 = arith.mulf %3, %4 : vector<2x2x128xf32>
    %14 = arith.subf %12, %13 : vector<2x2x128xf32>
    %15 = math.log %10 : vector<2x2x128xf32>
    %16 = arith.addf %14, %15 : vector<2x2x128xf32>
    %17 = tpu.reciprocal %10 {approx = true} : vector<2x2x128xf32> -> vector<2x2x128xf32>
    %cst_8 = arith.constant 0.000000e+00 : f32
    %18 = vector.broadcast %cst_8 : f32 to vector<2x2x128xf32>
    %19 = arith.cmpf oge, %3, %18 : vector<2x2x128xf32>
    %20 = arith.mulf %8, %17 : vector<2x2x128xf32>
    %21 = arith.select %19, %17, %20 : vector<2x2x128xi1>, vector<2x2x128xf32>
    %c0_9 = arith.constant 0 : index
    %c0_10 = arith.constant 0 : index
    %c0_11 = arith.constant 0 : index
    %c0_12 = arith.constant 0 : index
    %22 = vector.load %arg4[%c0_9, %c0_10, %c0_11, %c0_12] : memref<1x4x2x128xf32, #tpu.memory_space<vmem>>, vector<1x1x2x128xf32>
    %23 = vector.shape_cast %22 : vector<1x1x2x128xf32> to vector<2x128xf32>
    %cst_13 = arith.constant dense<0.000000e+00> : vector<2x128xf32>
    %24 = vector.multi_reduction <add>, %16, %cst_13 [1] : vector<2x2x128xf32> to vector<2x128xf32>
    %25 = arith.addf %23, %24 : vector<2x128xf32>
    %c0_14 = arith.constant 0 : index
    %c0_15 = arith.constant 0 : index
    %c0_16 = arith.constant 0 : index
    %c0_17 = arith.constant 0 : index
    %26 = vector.load %arg4[%c0_14, %c0_15, %c0_16, %c0_17] : memref<1x4x2x128xf32, #tpu.memory_space<vmem>>, vector<1x1x2x128xf32>
    %27 = vector.shape_cast %26 : vector<1x1x2x128xf32> to vector<2x128xf32>
    %28 = vector.shape_cast %25 : vector<2x128xf32> to vector<1x1x2x128xf32>
    tpu.vector_store %arg4[%c0_14, %c0_15, %c0_16, %c0_17], %28 {strides = array<i32>} : memref<1x4x2x128xf32, #tpu.memory_space<vmem>>, vector<1x1x2x128xf32>,
    %c0_18 = arith.constant 0 : index
    %c1 = arith.constant 1 : index
    %c0_19 = arith.constant 0 : index
    %c0_20 = arith.constant 0 : index
    %29 = vector.load %arg4[%c0_18, %c1, %c0_19, %c0_20] : memref<1x4x2x128xf32, #tpu.memory_space<vmem>>, vector<1x1x2x128xf32>
    %30 = vector.shape_cast %29 : vector<1x1x2x128xf32> to vector<2x128xf32>
    %31 = arith.mulf %21, %4 : vector<2x2x128xf32>
    %cst_21 = arith.constant dense<0.000000e+00> : vector<2x128xf32>
    %32 = vector.multi_reduction <add>, %31, %cst_21 [1] : vector<2x2x128xf32> to vector<2x128xf32>
    %33 = arith.addf %30, %32 : vector<2x128xf32>
    %c0_22 = arith.constant 0 : index
    %c1_23 = arith.constant 1 : index
    %c0_24 = arith.constant 0 : index
    %c0_25 = arith.constant 0 : index
    %34 = vector.load %arg4[%c0_22, %c1_23, %c0_24, %c0_25] : memref<1x4x2x128xf32, #tpu.memory_space<vmem>>, vector<1x1x2x128xf32>
    %35 = vector.shape_cast %34 : vector<1x1x2x128xf32> to vector<2x128xf32>
    %36 = vector.shape_cast %33 : vector<2x128xf32> to vector<1x1x2x128xf32>
    tpu.vector_store %arg4[%c0_22, %c1_23, %c0_24, %c0_25], %36 {strides = array<i32>} : memref<1x4x2x128xf32, #tpu.memory_space<vmem>>, vector<1x1x2x128xf32>,
    %c0_26 = arith.constant 0 : index
    %c2 = arith.constant 2 : index
    %c0_27 = arith.constant 0 : index
    %c0_28 = arith.constant 0 : index
    %37 = vector.load %arg4[%c0_26, %c2, %c0_27, %c0_28] : memref<1x4x2x128xf32, #tpu.memory_space<vmem>>, vector<1x1x2x128xf32>
    %38 = vector.shape_cast %37 : vector<1x1x2x128xf32> to vector<2x128xf32>
    %cst_29 = arith.constant dense<0.000000e+00> : vector<2x128xf32>
    %39 = vector.multi_reduction <add>, %21, %cst_29 [1] : vector<2x2x128xf32> to vector<2x128xf32>
    %40 = arith.addf %38, %39 : vector<2x128xf32>
    %c0_30 = arith.constant 0 : index
    %c2_31 = arith.constant 2 : index
    %c0_32 = arith.constant 0 : index
    %c0_33 = arith.constant 0 : index
    %41 = vector.load %arg4[%c0_30, %c2_31, %c0_32, %c0_33] : memref<1x4x2x128xf32, #tpu.memory_space<vmem>>, vector<1x1x2x128xf32>
    %42 = vector.shape_cast %41 : vector<1x1x2x128xf32> to vector<2x128xf32>
    %43 = vector.shape_cast %40 : vector<2x128xf32> to vector<1x1x2x128xf32>
    tpu.vector_store %arg4[%c0_30, %c2_31, %c0_32, %c0_33], %43 {strides = array<i32>} : memref<1x4x2x128xf32, #tpu.memory_space<vmem>>, vector<1x1x2x128xf32>,
    %c0_34 = arith.constant 0 : index
    %c3 = arith.constant 3 : index
    %c0_35 = arith.constant 0 : index
    %c0_36 = arith.constant 0 : index
    %44 = vector.load %arg4[%c0_34, %c3, %c0_35, %c0_36] : memref<1x4x2x128xf32, #tpu.memory_space<vmem>>, vector<1x1x2x128xf32>
    %45 = vector.shape_cast %44 : vector<1x1x2x128xf32> to vector<2x128xf32>
    %cst_37 = arith.constant dense<0.000000e+00> : vector<2x128xf32>
    %46 = vector.multi_reduction <add>, %4, %cst_37 [1] : vector<2x2x128xf32> to vector<2x128xf32>
    %47 = arith.addf %45, %46 : vector<2x128xf32>
    %c0_38 = arith.constant 0 : index
    %c3_39 = arith.constant 3 : index
    %c0_40 = arith.constant 0 : index
    %c0_41 = arith.constant 0 : index
    %48 = vector.load %arg4[%c0_38, %c3_39, %c0_40, %c0_41] : memref<1x4x2x128xf32, #tpu.memory_space<vmem>>, vector<1x1x2x128xf32>
    %49 = vector.shape_cast %48 : vector<1x1x2x128xf32> to vector<2x128xf32>
    %50 = vector.shape_cast %47 : vector<2x128xf32> to vector<1x1x2x128xf32>
    tpu.vector_store %arg4[%c0_38, %c3_39, %c0_40, %c0_41], %50 {strides = array<i32>} : memref<1x4x2x128xf32, #tpu.memory_space<vmem>>, vector<1x1x2x128xf32>,
    return
  }
  func.func @transform_0(%arg0: i32, %arg1: i32) -> (i32, i32, i32) {
    %c1_i32 = arith.constant 1 : i32
    %0 = arith.muli %arg0, %c1_i32 : i32
    %1 = arith.addi %0, %arg1 : i32
    %c0_i32 = arith.constant 0 : i32
    %c0_i32_0 = arith.constant 0 : i32
    %c0_i32_1 = arith.constant 0 : i32
    return %c0_i32, %1, %c0_i32_0 : i32, i32, i32
  }
  func.func @transform_1(%arg0: i32, %arg1: i32) -> (i32, i32, i32) {
    %c1_i32 = arith.constant 1 : i32
    %0 = arith.muli %arg0, %c1_i32 : i32
    %1 = arith.addi %0, %arg1 : i32
    %c0_i32 = arith.constant 0 : i32
    %c0_i32_0 = arith.constant 0 : i32
    %c0_i32_1 = arith.constant 0 : i32
    return %c0_i32, %1, %c0_i32_0 : i32, i32, i32
  }
  func.func @transform_2(%arg0: i32, %arg1: i32) -> (i32, i32, i32, i32) {
    %c0_i32 = arith.constant 0 : i32
    %c0_i32_0 = arith.constant 0 : i32
    %c0_i32_1 = arith.constant 0 : i32
    %c0_i32_2 = arith.constant 0 : i32
    return %arg0, %c0_i32, %c0_i32_0, %c0_i32_1 : i32, i32, i32, i32
  }
}

</mosaic_0001>

<bundles_post_ra>
// kernel: area_weighted_loss.1
= control target key start
LH: loop header
LB: loop body
LE: loop exit
PB: predicated region body
PF: predicated region fallthrough
CT: control target
= control target key end

     0   :  { %v213_v0 = vmov 0.0   ;;  %vm88_vm0 = vcmask 1041408   ;;  %vm105_vm1 = vcmask 1041409   ;;  %s295_s2 = inlined_call_operand.vmem [shape: f32[1,4,2,128], index: 2, kind: output, shape index: {}]   ;;  %s296_s0 = inlined_call_operand.vmem [shape: f32[2,2,128], index: 0, kind: input, shape index: {}]   ;;  %s297_s1 = inlined_call_operand.vmem [shape: f32[2,2,128], index: 1, kind: input, shape index: {}]  }
   0x1   :  { %49 = vst [vmem:[%s295_s2] sm:$0x3] %v213_v0  ;;  %50 = vst [vmem:[%s295_s2 + $0x2] sm:$0x3] %v213_v0  ;;  %v53_v1 = vld [vmem:[%s296_s0] sm:$0x3] }
   0x2   :  { %51 = vst [vmem:[%s295_s2 + $0x4] sm:$0x3] %v213_v0  ;;  %52 = vst [vmem:[%s295_s2 + $0x6] sm:$0x3] %v213_v0  ;;  %v247_v2 = vld [vmem:[%s296_s0 + $0x2] sm:$0x3] }
   0x3   :  { %v57_v3 = vand.u32 2147483647, %v53_v1  ;;  %v58_v4 = vand.u32 2147483647, %v247_v2  ;;  %v55_v5 = vld [vmem:[%s297_s1] sm:$0x3] }
   0x4   :  { %v56_v6 = vld [vmem:[%s297_s1 + $0x2] sm:$0x3]  ;;  %v158_v9 = vsel %vm88_vm0, %v55_v5, 0.0  ;;  %v67_v32 = vmax.f32 %v53_v1, 0.0  ;;  %v69_v33 = vmul.f32 %v55_v5, %v53_v1  ;;  %v68_v34 = vmax.f32 %v247_v2, 0.0 }
   0x5   :  { %v59_v7 = vsub.f32 0.0, %v57_v3  ;;  %v60_v8 = vsub.f32 0.0, %v58_v4  ;;  %v159_v10 = vrot.slane %v158_v9, 4  ;;  %v165_v11 = vsel %vm88_vm0, %v56_v6, 0.0 }
   0x6   :  { %v166_v14 = vrot.slane %v165_v11, 4  ;;  %v70_v35 = vmul.f32 %v56_v6, %v247_v2  ;;  %v71_v36 = vsub.f32 %v67_v32, %v69_v33  ;;  %vm81_vm2 = vcmp.ge.f32.partialorder %v53_v1, 0.0 }
   0x7   :  { %v61_v12 = vmul.f32 1.442695, %v59_v7  ;;  %v63_v13 = vmul.f32 1.442695, %v60_v8  ;;  %v160_v15 = vadd.f32 %v159_v10, %v158_v9  ;;  %vm82_vm3 = vcmp.ge.f32.partialorder %v247_v2, 0.0 }
   0x8   :  { %v167_v16 = vadd.f32 %v166_v14, %v165_v11  ;;  %v72_v38 = vsub.f32 %v68_v34, %v70_v35  ;;  %v194_v33 = vld [vmem:[%s295_s2 + $0x2] sm:$0x3] }
   0x9   :  { %201 = vpow2.f32 %v61_v12  ;;  %v161_v17 = vrot.slane %v160_v15, 2  ;;  %v198_v24 = vld [vmem:[%s295_s2 + $0x6] sm:$0x3] }
   0xa   :  { %203 = vpow2.f32 %v63_v13  ;;  %v168_v18 = vrot.slane %v167_v16, 2 }
   0xb   :  { %v162_v19 = vadd.f32 %v161_v17, %v160_v15 }
   0xc   :  { %v169_v20 = vadd.f32 %v168_v18, %v167_v16 }
   0xd   :  { %v163_v21 = vrot.slane %v162_v19, 1 }
   0xe   :  { %v170_v22 = vrot.slane %v169_v20, 1 }
   0xf   :  { %v164_v23 = vadd.f32 %v163_v21, %v162_v19 }
  0x10   :  { %v171_v25 = vadd.f32 %v170_v22, %v169_v20 }
  0x12   :  { %v174_v27 = vsel %vm105_vm1, %v171_v25, %v164_v23  ;;  %v87_v23 = vld [vmem:[%s295_s2] sm:$0x3] }
  0x13   :  { %v202_v26 = vpop.eup %201  ;;  %v176_v30 = vadd.f32 %v198_v24, %v174_v27  ;;  %v196_v27 = vld [vmem:[%s295_s2 + $0x4] sm:$0x3] }
  0x14   :  { %v204_v28 = vpop.eup %203  ;;  %v65_v29 = vadd.f32 1.0, %v202_v26 }
  0x15   :  { %v66_v31 = vadd.f32 1.0, %v204_v28  ;;  %199 = vst [vmem:[%s295_s2 + $0x6] sm:$0x3] %v176_v30 }
  0x16   :  { %205 = vlog2.f32 %v65_v29 }
  0x17   :  { %207 = vlog2.f32 %v66_v31 }
  0x18   :  { %209 = vrcp.f32 %v65_v29 }
  0x19   :  { %211 = vrcp.f32 %v66_v31 }
  0x20   :  { %v206_v37 = vpop.eup %205 }
  0x21   :  { %v208_v39 = vpop.eup %207  ;;  %v74_v40 = vmul.f32 0.6931472, %v206_v37 }
  0x22   :  { %v210_v41 = vpop.eup %209  ;;  %v76_v42 = vmul.f32 0.6931472, %v208_v39 }
  0x23   :  { %v212_v43 = vpop.eup %211  ;;  %v77_v44 = vadd.f32 %v74_v40, %v71_v36  ;;  %v83_v45 = vmul.f32 %v210_v41, %v202_v26 }
  0x24   :  { %v78_v46 = vadd.f32 %v76_v42, %v72_v38  ;;  %v84_v47 = vmul.f32 %v212_v43, %v204_v28 }
  0x25   :  { %v89_v48 = vsel %vm88_vm0, %v77_v44, 0.0  ;;  %v85_v49 = vsel %vm81_vm2, %v210_v41, %v83_v45 }
  0x26   :  { %v90_v50 = vrot.slane %v89_v48, 4  ;;  %v96_v51 = vsel %vm88_vm0, %v78_v46, 0.0  ;;  %v86_v52 = vsel %vm82_vm3, %v212_v43, %v84_v47  ;;  %v112_v53 = vmul.f32 %v85_v49, %v55_v5 }
  0x27   :  { %v97_v54 = vrot.slane %v96_v51, 4  ;;  %v113_v55 = vmul.f32 %v86_v52, %v56_v6  ;;  %v136_v56 = vsel %vm88_vm0, %v85_v49, 0.0  ;;  %v143_v57 = vsel %vm88_vm0, %v86_v52, 0.0 }
  0x28   :  { %v91_v58 = vadd.f32 %v90_v50, %v89_v48  ;;  %v114_v59 = vsel %vm88_vm0, %v112_v53, 0.0  ;;  %v137_v60 = vrot.slane %v136_v56, 4  ;;  %v144_v61 = vrot.slane %v143_v57, 4 }
  0x29   :  { %v98_v62 = vadd.f32 %v97_v54, %v96_v51  ;;  %v115_v63 = vrot.slane %v114_v59, 4  ;;  %v121_v0 = vsel %vm88_vm0, %v113_v55, 0.0 }
  0x2a   :  { %v92_v1 = vrot.slane %v91_v58, 2  ;;  %v122_v2 = vrot.slane %v121_v0, 4  ;;  %v138_v3 = vadd.f32 %v137_v60, %v136_v56  ;;  %v145_v4 = vadd.f32 %v144_v61, %v143_v57 }
  0x2b   :  { %v99_v5 = vrot.slane %v98_v62, 2  ;;  %v116_v7 = vadd.f32 %v115_v63, %v114_v59 }
  0x2c   :  { %v93_v6 = vadd.f32 %v92_v1, %v91_v58  ;;  %v123_v8 = vadd.f32 %v122_v2, %v121_v0  ;;  %v139_v9 = vrot.slane %v138_v3, 2  ;;  %v146_v10 = vrot.slane %v145_v4, 2 }
  0x2d   :  { %v100_v11 = vadd.f32 %v99_v5, %v98_v62  ;;  %v117_v12 = vrot.slane %v116_v7, 2 }
  0x2e   :  { %v94_v13 = vrot.slane %v93_v6, 1  ;;  %v124_v14 = vrot.slane %v123_v8, 2  ;;  %v140_v15 = vadd.f32 %v139_v9, %v138_v3  ;;  %v147_v16 = vadd.f32 %v146_v10, %v145_v4 }
  0x2f   :  { %v101_v17 = vrot.slane %v100_v11, 1  ;;  %v118_v18 = vadd.f32 %v117_v12, %v116_v7 }
  0x30   :  { %v95_v19 = vadd.f32 %v94_v13, %v93_v6  ;;  %v125_v20 = vadd.f32 %v124_v14, %v123_v8  ;;  %v141_v21 = vrot.slane %v140_v15, 1  ;;  %v148_v22 = vrot.slane %v147_v16, 1 }
  0x31   :  { %v102_v24 = vadd.f32 %v101_v17, %v100_v11  ;;  %v119_v25 = vrot.slane %v118_v18, 1 }
  0x32   :  { %v126_v26 = vrot.slane %v125_v20, 1  ;;  %v142_v28 = vadd.f32 %v141_v21, %v140_v15  ;;  %v149_v29 = vadd.f32 %v148_v22, %v147_v16 }
  0x33   :  { %v106_v30 = vsel %vm105_vm1, %v102_v24, %v95_v19  ;;  %v120_v31 = vadd.f32 %v119_v25, %v118_v18 }
  0x34   :  { %v108_v32 = vadd.f32 %v106_v30, %v87_v23  ;;  %v127_v34 = vadd.f32 %v126_v26, %v125_v20  ;;  %v152_v35 = vsel %vm105_vm1, %v149_v29, %v142_v28 }
  0x35   :  { %v154_v36 = vadd.f32 %v196_v27, %v152_v35 }
  0x36   :  { %109 = vst [vmem:[%s295_s2] sm:$0x3] %v108_v32  ;;  %v130_v37 = vsel %vm105_vm1, %v127_v34, %v120_v31 }
  0x37   :  { %v132_v38 = vadd.f32 %v194_v33, %v130_v37  ;;  %197 = vst [vmem:[%s295_s2 + $0x4] sm:$0x3] %v154_v36 }
  0x39   :  { %195 = vst [vmem:[%s295_s2 + $0x2] sm:$0x3] %v132_v38 }

</bundles_post_ra>
